<compile_context>
chip_gen: v5e
topology: v5e:2x2
jax: 0.10.0
libtpu: 0.0.40
codegen_flags: <defaults>
</compile_context>

<pallas_src>
import jax
import jax.numpy as jnp
import numpy as np
from jax.experimental import pallas as pl
from jax.experimental.pallas import tpu as pltpu

EPS = 1e-5  # PyTorch BatchNorm1d default eps


def _round_up(x, m):
    return ((x + m - 1) // m) * m


# ----------------------------- Pallas kernel -------------------------------- #

def _make_fused_kernel(n_ch):
    """Kernel taking n_ch input tiles + n_ch weight slabs + bias + output."""

    def kernel(*refs):
        xs = refs[:n_ch]                 # each (tile_n, L), input dtype
        ws = refs[n_ch:2 * n_ch]         # each (L, H_pad), bf16 (folded params)
        b_ref = refs[2 * n_ch]           # (1, H_pad), f32
        out_ref = refs[2 * n_ch + 1]     # (tile_n, H_pad), f32

        # bf16 MXU passes with f32 accumulation.  Casting x inside the kernel
        # keeps HBM traffic at the original input dtype (no wrapper-side copy).
        acc = jnp.dot(xs[0][...].astype(jnp.bfloat16), ws[0][...],
                      preferred_element_type=jnp.float32)
        for c in range(1, n_ch):
            acc = acc + jnp.dot(xs[c][...].astype(jnp.bfloat16), ws[c][...],
                                preferred_element_type=jnp.float32)
        out_ref[...] = jnp.maximum(acc + b_ref[...], 0.0)

    return kernel


# ------------------------ parameter folding (plain JAX) --------------------- #

def _fold_affine_chain(params, L):
    """Fold eval-mode BN1 -> Conv1d -> BN2 -> Linear -> BN3 into (W_eff, b_eff)."""
    (g1, b1, rm1, rv1, wc, bc, g2, b2, rm2, rv2, wl, bl, g3, b3, rm3, rv3) = params
    C_out, C_in, K = wc.shape
    assert K % 2 == 1, "padding=(K-1)//2 only gives 'same' length for odd kernel_size"
    assert wl.shape[1] == C_out * L, "Linear in_features must be input_size*out_channels"
    pad = (K - 1) // 2
    f32 = jnp.float32

    # BN -> scale/shift
    s1 = (g1 / jnp.sqrt(rv1 + EPS)).astype(f32); t1 = (b1.astype(f32) - rm1 * s1)
    s2 = (g2 / jnp.sqrt(rv2 + EPS)).astype(f32); t2 = (b2.astype(f32) - rm2 * s2)
    s3 = (g3 / jnp.sqrt(rv3 + EPS)).astype(f32); t3 = (b3.astype(f32) - rm3 * s3)

    # Conv1d (cross-correlation, zero padded) as a banded matrix A of shape
    # (C_in*L, C_out*L):  A[c*L + li, o*L + lo] = wc[o, c, li - lo + pad]
    li = jnp.arange(L)[:, None]
    lo = jnp.arange(L)[None, :]
    k = li - lo + pad                                            # (L_in, L_out)
    valid = (k >= 0) & (k < K)
    gathered = wc.astype(f32)[:, :, jnp.clip(k, 0, K - 1)]       # (C_out, C_in, L, L)
    band = jnp.where(valid[None, None, :, :], gathered, 0.0)
    A = jnp.transpose(band, (1, 2, 0, 3)).reshape(C_in * L, C_out * L)

    # Expand per-channel BN vectors to the flattened coordinate (c*L+l / o*L+l).
    s1e = jnp.repeat(s1, L); t1e = jnp.repeat(t1, L)             # (C_in*L,)
    s2e = jnp.repeat(s2, L); t2e = jnp.repeat(t2, L)             # (C_out*L,)
    bce = jnp.repeat(bc.astype(f32), L)                          # (C_out*L,)

    A_s2 = A * s2e[None, :]                      # BN2 folded into conv matrix
    B_s3 = wl.T.astype(f32) * s3[None, :]        # BN3 folded into linear weight

    w_eff = (s1e[:, None] * A_s2) @ B_s3                         # (C_in*L, H)
    b_eff = (t1e @ A_s2 + bce * s2e + t2e) @ B_s3 + bl.astype(f32) * s3 + t3
    return w_eff, b_eff


def fold_convtranse_params(params, L):
    """Fold once per parameter set (hoisted out of the per-call path).

    Returns (w_slabs, b_pad, H):
      w_slabs : tuple of C_in arrays (L, H_pad), bf16, zero-padded columns
      b_pad   : (1, H_pad) f32
      H       : true hidden size (for final slicing)
    """
    w_eff, b_eff = _fold_affine_chain(params, L)                 # (C_in*L, H), (H,)
    C_in = w_eff.shape[0] // L
    H = w_eff.shape[1]

    # Lane-dense output width: 128 minimum; 256-aligned once H > 128 so the
    # MXU N dimension is full on v6e/v7x's 2x256x256 arrays.
    H_pad = _round_up(H, 256) if H > 128 else 128

    w_pad = jnp.pad(w_eff, ((0, 0), (0, H_pad - H)))
    w_slabs = tuple(
        w_pad[c * L:(c + 1) * L, :].astype(jnp.bfloat16) for c in range(C_in))
    b_pad = jnp.pad(b_eff, (0, H_pad - H)).reshape(1, H_pad).astype(jnp.float32)
    return w_slabs, b_pad, H


# ------------------------------ forward wrapper ------------------------------ #

def convtranse_forward(folded, *tuples, tile_n=256):
    """Eval-mode ConvTransE forward from pre-folded params.

    tuples: in_channels arrays of shape (N, hidden_size=L), fed to the kernel
    unmodified (no concat, no batch padding -> minimal HBM traffic).
    """
    w_slabs, b_pad, H = folded
    n_ch = len(tuples)
    assert n_ch == len(w_slabs), "number of tuples must match in_channels"
    N, L = tuples[0].shape
    for t in tuples:
        assert t.shape == (N, L)
    H_pad = w_slabs[0].shape[1]

    # No batch padding: partial final block is handled by Pallas (OOB input
    # rows are garbage but only affect OOB output rows, whose stores are
    # dropped; nothing downstream sees them).
    grid_n = pl.cdiv(N, tile_n)

    # Explicit VMEM budget (double buffers for every operand + headroom) so the
    # config is safe on v7x's 64 MiB / 32 MiB scoped default and v5e's 16 MiB
    # scoped default.  All last dims are lane-padded to 128 for the estimate.
    lane = 128
    x_bytes = n_ch * 2 * tile_n * _round_up(L, lane) * tuples[0].dtype.itemsize
    w_bytes = n_ch * 2 * _round_up(L, 16) * H_pad * 2          # bf16 weights
    b_bytes = 2 * 8 * H_pad * 4
    o_bytes = 2 * tile_n * H_pad * 4
    vmem_limit = min(2 * (x_bytes + w_bytes + b_bytes + o_bytes) + (4 << 20),
                     56 << 20)

    in_specs = (
        # Raw per-channel inputs, tiled over the batch axis only.
        [pl.BlockSpec((tile_n, L), lambda i: (i, 0)) for _ in range(n_ch)]
        # Grid-invariant folded weight slabs (bf16) and bias.  At production
        # sizes where 2x the weight footprint matters (v7x 64 MiB VMEM), add
        # pipeline_mode=pl.Buffered(1) here or a second 'parallel' grid axis
        # over H with BlockSpec((L, tile_h), lambda i, j: (0, j)).
        + [pl.BlockSpec((L, H_pad), lambda i: (0, 0)) for _ in range(n_ch)]
        + [pl.BlockSpec((1, H_pad), lambda i: (0, 0))]
    )

    out = pl.pallas_call(
        _make_fused_kernel(n_ch),
        out_shape=jax.ShapeDtypeStruct((N, H_pad), jnp.float32),
        grid=(grid_n,),
        in_specs=in_specs,
        out_specs=pl.BlockSpec((tile_n, H_pad), lambda i: (i, 0)),
        compiler_params=pltpu.CompilerParams(
            dimension_semantics=("parallel",),   # shards grid over v7x's 2 TCs
            vmem_limit_bytes=int(vmem_limit)),
    )(*tuples, *w_slabs, b_pad)

    return out[:, :H]


# ------------------------------ params / reference --------------------------- #

def init_params(key, input_size, hidden_size, in_channels, out_channels, kernel_size):
    ks = jax.random.split(key, 16)
    f32 = jnp.float32
    g1 = 1.0 + 0.1 * jax.random.normal(ks[0], (in_channels,), f32)
    b1 = 0.1 * jax.random.normal(ks[1], (in_channels,), f32)
    rm1 = 0.1 * jax.random.normal(ks[2], (in_channels,), f32)
    rv1 = jax.random.uniform(ks[3], (in_channels,), f32, 0.5, 1.5)
    wc = 0.2 * jax.random.normal(ks[4], (out_channels, in_channels, kernel_size), f32)
    bc = 0.1 * jax.random.normal(ks[5], (out_channels,), f32)
    g2 = 1.0 + 0.1 * jax.random.normal(ks[6], (out_channels,), f32)
    b2 = 0.1 * jax.random.normal(ks[7], (out_channels,), f32)
    rm2 = 0.1 * jax.random.normal(ks[8], (out_channels,), f32)
    rv2 = jax.random.uniform(ks[9], (out_channels,), f32, 0.5, 1.5)
    wl = 0.05 * jax.random.normal(ks[10], (hidden_size, input_size * out_channels), f32)
    bl = 0.1 * jax.random.normal(ks[11], (hidden_size,), f32)
    g3 = 1.0 + 0.1 * jax.random.normal(ks[12], (hidden_size,), f32)
    b3 = 0.1 * jax.random.normal(ks[13], (hidden_size,), f32)
    rm3 = 0.1 * jax.random.normal(ks[14], (hidden_size,), f32)
    rv3 = jax.random.uniform(ks[15], (hidden_size,), f32, 0.5, 1.5)
    return (g1, b1, rm1, rv1, wc, bc, g2, b2, rm2, rv2, wl, bl, g3, b3, rm3, rv3)


def ref_forward(params, *tuples):
    """Pure-JAX reference mirroring the PyTorch module in eval mode (f32)."""
    (g1, b1, rm1, rv1, wc, bc, g2, b2, rm2, rv2, wl, bl, g3, b3, rm3, rv3) = params
    x = jnp.stack(tuples, axis=1).astype(jnp.float32)
    x = (x - rm1[None, :, None]) * (g1 / jnp.sqrt(rv1 + EPS))[None, :, None] + b1[None, :, None]
    pad = (wc.shape[-1] - 1) // 2
    feat = jax.lax.conv_general_dilated(
        x, wc, window_strides=(1,), padding=[(pad, pad)],
        dimension_numbers=("NCH", "OIH", "NCH")) + bc[None, :, None]
    feat = (feat - rm2[None, :, None]) * (g2 / jnp.sqrt(rv2 + EPS))[None, :, None] + b2[None, :, None]
    flat = feat.reshape(feat.shape[0], -1)
    y = flat @ wl.T + bl
    y = (y - rm3) * (g3 / jnp.sqrt(rv3 + EPS)) + b3
    return jnp.maximum(y, 0.0)


if __name__ == "__main__":
    # ConvTransE(input_size=32, hidden_size=32, in_channels=2, out_channels=4,
    #            kernel_size=3, dropout=0.2) — dropout is identity in eval mode.
    input_size = hidden_size = 32
    in_channels, out_channels, kernel_size = 2, 4, 3
    num_triplets = 300   # not a multiple of tile_n: exercises the partial last block

    key = jax.random.PRNGKey(0)
    kp, ka, kb = jax.random.split(key, 3)
    params = init_params(kp, input_size, hidden_size, in_channels, out_channels, kernel_size)

    # forward(*tuples): in_channels tensors of shape (num_triplets, hidden_size)
    ent_emb = jax.random.normal(ka, (num_triplets, hidden_size), jnp.float32)
    rel_emb = jax.random.normal(kb, (num_triplets, hidden_size), jnp.float32)

    # Fold the affine chain ONCE (outside the per-call path), then run the
    # kernel with the default 256-row batch tile -> grid of 2 steps.
    folded = jax.tree_util.tree_map(jax.block_until_ready,
                                    fold_convtranse_params(params, hidden_size))
    fwd = jax.jit(lambda e, r: convtranse_forward(folded, e, r, tile_n=256))

    out = jax.block_until_ready(fwd(ent_emb, rel_emb))

    ref = jax.block_until_ready(ref_forward(params, ent_emb, rel_emb))
    # bf16 MXU passes (f32 accumulation) vs. the f32 reference: looser tolerance.
    np.testing.assert_allclose(np.asarray(out), np.asarray(ref), rtol=2e-2, atol=2e-2)

    print("KERNEL_OK")
</pallas_src>

<mosaic_0001>
module attributes {stable_mosaic.version = 11 : i64} {
  func.func @kernel(%arg0: i32, %arg1: memref<256x32xf32, #tpu.memory_space<vmem>>, %arg2: memref<256x32xf32, #tpu.memory_space<vmem>>, %arg3: memref<32x128xbf16, #tpu.memory_space<vmem>>, %arg4: memref<32x128xbf16, #tpu.memory_space<vmem>>, %arg5: memref<1x128xf32, #tpu.memory_space<vmem>>, %arg6: memref<256x128xf32, #tpu.memory_space<vmem>>) attributes {dimension_semantics = [#tpu.dimension_semantics<parallel>], iteration_bounds = array<i64: 2>, scalar_prefetch = 0 : i64, scratch_operands = 0 : i64, tpu.core_type = #tpu.core_type<tc>, window_params = [{transform_indices = @transform_0, window_bounds = array<i64: 256, 32>}, {transform_indices = @transform_1, window_bounds = array<i64: 256, 32>}, {pipeline_mode = #tpu.pipeline_mode<synchronous>, transform_indices = @transform_2, window_bounds = array<i64: 32, 128>}, {pipeline_mode = #tpu.pipeline_mode<synchronous>, transform_indices = @transform_3, window_bounds = array<i64: 32, 128>}, {pipeline_mode = #tpu.pipeline_mode<synchronous>, transform_indices = @transform_4, window_bounds = array<i64: 1, 128>}, {transform_indices = @transform_5, window_bounds = array<i64: 256, 128>}]} {
    %c0 = arith.constant 0 : index
    %c0_0 = arith.constant 0 : index
    %0 = vector.load %arg1[%c0, %c0_0] : memref<256x32xf32, #tpu.memory_space<vmem>>, vector<256x32xf32>
    %1 = arith.truncf %0 : vector<256x32xf32> to vector<256x32xbf16>
    %c0_1 = arith.constant 0 : index
    %c0_2 = arith.constant 0 : index
    %2 = vector.load %arg3[%c0_1, %c0_2] : memref<32x128xbf16, #tpu.memory_space<vmem>>, vector<32x128xbf16>
    %cst = arith.constant dense<0.000000e+00> : vector<256x128xf32>
    %3 = tpu.matmul %1, %2, %cst {dimension_numbers = #tpu.dot_dimension_numbers<[1], [0], [0], [1], [0, 0, 1, 1], [], []>} : vector<256x32xbf16>, vector<32x128xbf16>, vector<256x128xf32> -> vector<256x128xf32>
    %c0_3 = arith.constant 0 : index
    %c0_4 = arith.constant 0 : index
    %4 = vector.load %arg2[%c0_3, %c0_4] : memref<256x32xf32, #tpu.memory_space<vmem>>, vector<256x32xf32>
    %5 = arith.truncf %4 : vector<256x32xf32> to vector<256x32xbf16>
    %c0_5 = arith.constant 0 : index
    %c0_6 = arith.constant 0 : index
    %6 = vector.load %arg4[%c0_5, %c0_6] : memref<32x128xbf16, #tpu.memory_space<vmem>>, vector<32x128xbf16>
    %cst_7 = arith.constant dense<0.000000e+00> : vector<256x128xf32>
    %7 = tpu.matmul %5, %6, %cst_7 {dimension_numbers = #tpu.dot_dimension_numbers<[1], [0], [0], [1], [0, 0, 1, 1], [], []>} : vector<256x32xbf16>, vector<32x128xbf16>, vector<256x128xf32> -> vector<256x128xf32>
    %8 = arith.addf %3, %7 : vector<256x128xf32>
    %c0_8 = arith.constant 0 : index
    %c0_9 = arith.constant 0 : index
    %9 = vector.load %arg5[%c0_8, %c0_9] : memref<1x128xf32, #tpu.memory_space<vmem>>, vector<1x128xf32>
    %10 = vector.broadcast %9 : vector<1x128xf32> to vector<256x128xf32>
    %11 = arith.addf %8, %10 : vector<256x128xf32>
    %cst_10 = arith.constant 0.000000e+00 : f32
    %12 = vector.broadcast %cst_10 : f32 to vector<256x128xf32>
    %13 = arith.maximumf %11, %12 : vector<256x128xf32>
    %c0_11 = arith.constant 0 : index
    %c0_12 = arith.constant 0 : index
    %14 = vector.load %arg6[%c0_11, %c0_12] : memref<256x128xf32, #tpu.memory_space<vmem>>, vector<256x128xf32>
    tpu.vector_store %arg6[%c0_11, %c0_12], %13 {strides = array<i32>} : memref<256x128xf32, #tpu.memory_space<vmem>>, vector<256x128xf32>,
    return
  }
  func.func @transform_0(%arg0: i32) -> (i32, i32) {
    %c0_i32 = arith.constant 0 : i32
    %c0_i32_0 = arith.constant 0 : i32
    return %arg0, %c0_i32 : i32, i32
  }
  func.func @transform_1(%arg0: i32) -> (i32, i32) {
    %c0_i32 = arith.constant 0 : i32
    %c0_i32_0 = arith.constant 0 : i32
    return %arg0, %c0_i32 : i32, i32
  }
  func.func @transform_2(%arg0: i32) -> (i32, i32) {
    %c0_i32 = arith.constant 0 : i32
    %c0_i32_0 = arith.constant 0 : i32
    %c0_i32_1 = arith.constant 0 : i32
    return %c0_i32, %c0_i32_0 : i32, i32
  }
  func.func @transform_3(%arg0: i32) -> (i32, i32) {
    %c0_i32 = arith.constant 0 : i32
    %c0_i32_0 = arith.constant 0 : i32
    %c0_i32_1 = arith.constant 0 : i32
    return %c0_i32, %c0_i32_0 : i32, i32
  }
  func.func @transform_4(%arg0: i32) -> (i32, i32) {
    %c0_i32 = arith.constant 0 : i32
    %c0_i32_0 = arith.constant 0 : i32
    %c0_i32_1 = arith.constant 0 : i32
    return %c0_i32, %c0_i32_0 : i32, i32
  }
  func.func @transform_5(%arg0: i32) -> (i32, i32) {
    %c0_i32 = arith.constant 0 : i32
    %c0_i32_0 = arith.constant 0 : i32
    return %arg0, %c0_i32 : i32, i32
  }
}

</mosaic_0001>

<bundles_post_ra>
// kernel: _lambda_.1
= control target key start
LH: loop header
LB: loop body
LE: loop exit
PB: predicated region body
PF: predicated region fallthrough
CT: control target
= control target key end

     0   :  { %s1436_s18 = smov 0   ;;  %s1438_s19 = smov 0   ;;  %s1802_s0 = inlined_call_operand.vmem [shape: f32[300,32], index: 0, kind: input, shape index: {}]   ;;  %s1803_s1 = inlined_call_operand.vmem [shape: f32[300,32], index: 1, kind: input, shape index: {}]   ;;  %s1804_s2 = inlined_call_operand.vmem [shape: bf16[32,128], index: 2, kind: input, shape index: {}]   ;;  %s1805_s3 = inlined_call_operand.vmem [shape: bf16[32,128], index: 3, kind: input, shape index: {}]   ;;  %s1806_s4 = inlined_call_operand.vmem [shape: f32[1,128], index: 4, kind: input, shape index: {}]   ;;  %s1807_s5 = inlined_call_operand.vmem [shape: f32[300,128], index: 5, kind: output, shape index: {}]  }
   0x1   :  { %s1440_s20 = smov 0  }
   0x2 LB: > { %s1449_s21 = sadd.s32 4294967295, %s1372_s20   ;;  %s1451_s22 = sadd.s32 1, %s1372_s20   ;;  %s1372_s20 = sphi %s1440_s20, %s1816_s20   ;;  %s1368_s19 = sphi %s1438_s19, %s1815_s19   ;;  %s1364_s18 = sphi %s1436_s18, %s1814_s18  }
   0x3   : > { %s134_s23 = ssub.s32 %s1372_s20, %s1451_s22  ;;  %s137_s24 = sadd.s32 1, %s1368_s19 }
   0x4   : > { %p135_p0 = scmp.eq.s32.totalorder %s134_s23, 0  ;;  %p147_p1 = scmp.ne.s32.totalorder %s1368_s19, %s1364_s18 }
   0x5   : > { %p148_p2 = scmp.eq.s32.totalorder %s1449_s21, 1  ;;  %p1147_p3 = scmp.ge.s32.totalorder %s1372_s20, 1 }
   0x6   : > { %s1459_s25 = scalar_select %p135_p0, %s1368_s19, %s137_s24  }
   0x7   : > { %p1461_p4 = por %p148_p2, %p147_p1  ;;  %p215_p5 = scmp.lt.s32.totalorder %s1372_s20, 3 }
   0x9   : > { %p216_p6 = pnand %p1147_p3, %p215_p5 }
   0xa   : > { %s1472_s6 = sshll.u32 (!%p216_p6), %s1449_s21, 5  ;;  %s252_s23 = sand.u32 (!%p216_p6), 1, %s1364_s18  }
   0xb   : > { %219 = sbr.rel (%p216_p6) target bundleno = 349 (0x15d), region = 40  ;;  %p260_p7 = scmp.lt.s32.totalorder (!%p216_p6), %s1472_s6, 37 }
   0xc   : > { %s1148_s28 = sshll.u32 (!%p216_p6), %s252_s23, 8 }
   0xd   : > { %s1595_s29 = scalar_lea.vmem (!%p216_p6), [#allocation2], %s1148_s28  }
  0x10   : > { %v1221_v0 = vld [vmem:[%s1805_s3 + $0x8] sm:$0xff]  ;;  %v1220_v2 = vld [vmem:[%s1805_s3] sm:$0xff]  ;;  %s261_s11 = scalar_select %p260_p7, %s1472_s6, 37  ;;  %vm405_vm0 = vcmask 261120  }
  0x11   : > { %v1219_v1 = vld [vmem:[%s1804_s2 + $0x8] sm:$0xff]  ;;  %460 = vmatpush.bf16.msra.mxu0 %v1221_v0  ;;  %1225 = vmatpush.bf16.msra.mxu2 %v1221_v0  ;;  %v1218_v3 = vld [vmem:[%s1804_s2] sm:$0xff]  ;;  %s800_s18 = ssub.s32 (%p1461_p4), 38, %s1472_s6  ;;  %s1222_s30 = sshll.u32 (%p1461_p4), %s1449_s21, 8 }
  0x12   : > { %609 = vmatpush.bf16.msra.mxu1 %v1219_v1  ;;  %1227 = vmatpush.bf16.msra.mxu3 %v1219_v1  ;;  %s1150_s12 = sshll.u32 %s261_s11, 3  ;;  %p801_p8 = scmp.lt.s32.totalorder (%p1461_p4), %s800_s18, 32 }
  0x13   : > { %s1485_s15 = scalar_lea.vmem %s1803_s1, %s1150_s12  ;;  %s1490_s20 = scalar_lea.vmem %s1802_s0, %s1150_s12 }
  0x14   : > { %v341_v4 = vld [vmem:[%s1485_s15] sm:$0xff]  ;;  %v342_v5 = vld [vmem:[%s1485_s15 + $0x8] sm:$0xff]  ;;  %v343_v16 = vld [vmem:[%s1485_s15 + $0x10] sm:$0xff]  ;;  %s1667_s9 = scalar_lea.vmem (%p1461_p4), %s1807_s5, %s1222_s30  }
  0x15   : > { %461 = vmatpush.bf16.msra.mxu0 %v1220_v2  ;;  %1226 = vmatpush.bf16.msra.mxu2 %v1220_v2  ;;  %v357_v6 = vld [vmem:[%s1485_s15 + $0x80] sm:$0xff]  ;;  %v373_v7 = vpack.c.bf16 %v342_v5, %v341_v4  ;;  %v358_v8 = vld [vmem:[%s1485_s15 + $0x88] sm:$0xff]  ;;  %v344_v17 = vld [vmem:[%s1485_s15 + $0x18] sm:$0xff] }
  0x16   : > { %610 = vmatpush.bf16.msra.mxu1 %v1218_v3  ;;  %1228 = vmatpush.bf16.msra.mxu3 %v1218_v3  ;;  %v289_v9 = vld [vmem:[%s1490_s20] sm:$0xff]  ;;  %v290_v10 = vld [vmem:[%s1490_s20 + $0x8] sm:$0xff]  ;;  %v381_v11 = vpack.c.bf16 %v358_v8, %v357_v6  ;;  %v359_v18 = vld [vmem:[%s1485_s15 + $0x90] sm:$0xff]  ;;  %v374_v24 = vpack.c.bf16 %v344_v17, %v343_v16 }
  0x17   : > { %v321_v12 = vpack.c.bf16 %v290_v10, %v289_v9  ;;  %v305_v13 = vld [vmem:[%s1490_s20 + $0x80] sm:$0xff]  ;;  %v306_v14 = vld [vmem:[%s1490_s20 + $0x88] sm:$0xff]  ;;  %v360_v19 = vld [vmem:[%s1485_s15 + $0x98] sm:$0xff] }
  0x18   : > { %1161 = vmatmul.msk.bf16.vlgmr.msra.gmra.mxu0 %vm405_vm0, %v373_v7  ;;  %v329_v15 = vpack.c.bf16 %v306_v14, %v305_v13  ;;  %1169 = vmatmul.msk.bf16.vlgmr.msra.gmra.mxu2 %vm405_vm0, %v381_v11  ;;  %v291_v20 = vld [vmem:[%s1490_s20 + $0x10] sm:$0xff]  ;;  %v292_v21 = vld [vmem:[%s1490_s20 + $0x18] sm:$0xff]  ;;  %v382_v25 = vpack.c.bf16 %v360_v19, %v359_v18  ;;  %v345_v28 = vld [vmem:[%s1485_s15 + $0x20] sm:$0xff] }
  0x19   : > { %1185 = vmatmul.msk.bf16.vlgmr.msra.gmra.mxu1 %vm405_vm0, %v321_v12  ;;  %v307_v22 = vld [vmem:[%s1490_s20 + $0x90] sm:$0xff]  ;;  %v308_v23 = vld [vmem:[%s1490_s20 + $0x98] sm:$0xff]  ;;  %v322_v26 = vpack.c.bf16 %v292_v21, %v291_v20  ;;  %v346_v29 = vld [vmem:[%s1485_s15 + $0x28] sm:$0xff] }
  0x1a   : > { %1193 = vmatmul.msk.bf16.vlgmr.msra.gmra.mxu3 %vm405_vm0, %v329_v15  ;;  %v330_v27 = vpack.c.bf16 %v308_v23, %v307_v22  ;;  %v361_v30 = vld [vmem:[%s1485_s15 + $0xa0] sm:$0xff]  ;;  %v362_v31 = vld [vmem:[%s1485_s15 + $0xa8] sm:$0xff]  ;;  %v375_v36 = vpack.c.bf16 %v346_v29, %v345_v28  ;;  %v347_v40 = vld [vmem:[%s1485_s15 + $0x30] sm:$0xff] }
  0x1b   : > { %v293_v32 = vld [vmem:[%s1490_s20 + $0x20] sm:$0xff]  ;;  %v294_v33 = vld [vmem:[%s1490_s20 + $0x28] sm:$0xff]  ;;  %v383_v37 = vpack.c.bf16 %v362_v31, %v361_v30  ;;  %v348_v41 = vld [vmem:[%s1485_s15 + $0x38] sm:$0xff] }
  0x1c   : > { %v309_v34 = vld [vmem:[%s1490_s20 + $0xa0] sm:$0xff]  ;;  %v310_v35 = vld [vmem:[%s1490_s20 + $0xa8] sm:$0xff]  ;;  %v323_v38 = vpack.c.bf16 %v294_v33, %v293_v32  ;;  %v363_v42 = vld [vmem:[%s1485_s15 + $0xb0] sm:$0xff]  ;;  %v376_v48 = vpack.c.bf16 %v348_v41, %v347_v40 }
  0x1d   : > { %v331_v39 = vpack.c.bf16 %v310_v35, %v309_v34  ;;  %v364_v43 = vld [vmem:[%s1485_s15 + $0xb8] sm:$0xff]  ;;  %v295_v44 = vld [vmem:[%s1490_s20 + $0x30] sm:$0xff]  ;;  %v349_v52 = vld [vmem:[%s1485_s15 + $0x40] sm:$0xff] }
  0x1e   : > { %v296_v45 = vld [vmem:[%s1490_s20 + $0x38] sm:$0xff]  ;;  %v311_v46 = vld [vmem:[%s1490_s20 + $0xb0] sm:$0xff]  ;;  %v384_v49 = vpack.c.bf16 %v364_v43, %v363_v42  ;;  %v350_v53 = vld [vmem:[%s1485_s15 + $0x48] sm:$0xff] }
  0x1f   : > { %v312_v47 = vld [vmem:[%s1490_s20 + $0xb8] sm:$0xff]  ;;  %v324_v50 = vpack.c.bf16 %v296_v45, %v295_v44  ;;  %v365_v54 = vld [vmem:[%s1485_s15 + $0xc0] sm:$0xff]  ;;  %v366_v55 = vld [vmem:[%s1485_s15 + $0xc8] sm:$0xff]  ;;  %v377_v60 = vpack.c.bf16 %v350_v53, %v349_v52 }
  0x20   : > { %v332_v51 = vpack.c.bf16 %v312_v47, %v311_v46  ;;  %v297_v56 = vld [vmem:[%s1490_s20 + $0x40] sm:$0xff]  ;;  %v298_v57 = vld [vmem:[%s1490_s20 + $0x48] sm:$0xff]  ;;  %v385_v61 = vpack.c.bf16 %v366_v55, %v365_v54  ;;  %v351_v0 = vld [vmem:[%s1485_s15 + $0x50] sm:$0xff] }
  0x21   : > { %v313_v58 = vld [vmem:[%s1490_s20 + $0xc0] sm:$0xff]  ;;  %v314_v59 = vld [vmem:[%s1490_s20 + $0xc8] sm:$0xff]  ;;  %v325_v62 = vpack.c.bf16 %v298_v57, %v297_v56  ;;  %v352_v1 = vld [vmem:[%s1485_s15 + $0x58] sm:$0xff] }
  0x22   : > { %v333_v63 = vpack.c.bf16 %v314_v59, %v313_v58  ;;  %v367_v2 = vld [vmem:[%s1485_s15 + $0xd0] sm:$0xff]  ;;  %v368_v3 = vld [vmem:[%s1485_s15 + $0xd8] sm:$0xff]  ;;  %v378_v8 = vpack.c.bf16 %v352_v1, %v351_v0  ;;  %v353_v12 = vld [vmem:[%s1485_s15 + $0x60] sm:$0xff] }
  0x23   : > { %v299_v4 = vld [vmem:[%s1490_s20 + $0x50] sm:$0xff]  ;;  %v300_v5 = vld [vmem:[%s1490_s20 + $0x58] sm:$0xff]  ;;  %v386_v9 = vpack.c.bf16 %v368_v3, %v367_v2  ;;  %v354_v13 = vld [vmem:[%s1485_s15 + $0x68] sm:$0xff] }
  0x24   : > { %v315_v6 = vld [vmem:[%s1490_s20 + $0xd0] sm:$0xff]  ;;  %v316_v7 = vld [vmem:[%s1490_s20 + $0xd8] sm:$0xff]  ;;  %v326_v10 = vpack.c.bf16 %v300_v5, %v299_v4  ;;  %v369_v14 = vld [vmem:[%s1485_s15 + $0xe0] sm:$0xff]  ;;  %v379_v20 = vpack.c.bf16 %v354_v13, %v353_v12 }
  0x25   : > { %v334_v11 = vpack.c.bf16 %v316_v7, %v315_v6  ;;  %v370_v15 = vld [vmem:[%s1485_s15 + $0xe8] sm:$0xff]  ;;  %v301_v16 = vld [vmem:[%s1490_s20 + $0x60] sm:$0xff]  ;;  %v303_v28 = vld [vmem:[%s1490_s20 + $0x70] sm:$0xff] }
  0x26   : > { %v302_v17 = vld [vmem:[%s1490_s20 + $0x68] sm:$0xff]  ;;  %v317_v18 = vld [vmem:[%s1490_s20 + $0xe0] sm:$0xff]  ;;  %v387_v21 = vpack.c.bf16 %v370_v15, %v369_v14  ;;  %v304_v29 = vld [vmem:[%s1490_s20 + $0x78] sm:$0xff] }
  0x27   : > { %v318_v19 = vld [vmem:[%s1490_s20 + $0xe8] sm:$0xff]  ;;  %v327_v22 = vpack.c.bf16 %v302_v17, %v301_v16  ;;  %v319_v30 = vld [vmem:[%s1490_s20 + $0xf0] sm:$0xff]  ;;  %v320_v31 = vld [vmem:[%s1490_s20 + $0xf8] sm:$0xff]  ;;  %v328_v34 = vpack.c.bf16 %v304_v29, %v303_v28 }
  0x28   : > { %1162 = vmatmul.msk.bf16.gmra.mxu0 %vm405_vm0, %v374_v24  ;;  %1170 = vmatmul.msk.bf16.gmra.mxu2 %vm405_vm0, %v382_v25  ;;  %v335_v23 = vpack.c.bf16 %v318_v19, %v317_v18  ;;  %v355_v24 = vld [vmem:[%s1485_s15 + $0x70] sm:$0xff]  ;;  %v356_v25 = vld [vmem:[%s1485_s15 + $0x78] sm:$0xff]  ;;  %v336_v35 = vpack.c.bf16 %v320_v31, %v319_v30 }
  0x29   : > { %1186 = vmatmul.msk.bf16.gmra.mxu1 %vm405_vm0, %v322_v26  ;;  %v371_v26 = vld [vmem:[%s1485_s15 + $0xf0] sm:$0xff]  ;;  %v380_v32 = vpack.c.bf16 %v356_v25, %v355_v24 }
  0x2a   : > { %1194 = vmatmul.msk.bf16.gmra.mxu3 %vm405_vm0, %v330_v27  ;;  %v372_v27 = vld [vmem:[%s1485_s15 + $0xf8] sm:$0xff] }
  0x2b   : > { %v388_v33 = vpack.c.bf16 %v372_v27, %v371_v26 }
  0x38   : > { %1163 = vmatmul.msk.bf16.gmra.mxu0 %vm405_vm0, %v375_v36  ;;  %1171 = vmatmul.msk.bf16.gmra.mxu2 %vm405_vm0, %v383_v37  ;;  %v1592_v37 = vld [vmem:[%s1806_s4] ss:$0 sm:$0xff] }
  0x39   : > { %1187 = vmatmul.msk.bf16.gmra.mxu1 %vm405_vm0, %v323_v38 }
  0x3a   : > { %1195 = vmatmul.msk.bf16.gmra.mxu3 %vm405_vm0, %v331_v39 }
  0x48   : > { %1164 = vmatmul.msk.bf16.gmra.mxu0 %vm405_vm0, %v376_v48  ;;  %1172 = vmatmul.msk.bf16.gmra.mxu2 %vm405_vm0, %v384_v49 }
  0x49   : > { %1188 = vmatmul.msk.bf16.gmra.mxu1 %vm405_vm0, %v324_v50 }
  0x4a   : > { %1196 = vmatmul.msk.bf16.gmra.mxu3 %vm405_vm0, %v332_v51 }
  0x58   : > { %1165 = vmatmul.msk.bf16.gmra.mxu0 %vm405_vm0, %v377_v60  ;;  %1173 = vmatmul.msk.bf16.gmra.mxu2 %vm405_vm0, %v385_v61 }
  0x59   : > { %1189 = vmatmul.msk.bf16.gmra.mxu1 %vm405_vm0, %v325_v62 }
  0x5a   : > { %1197 = vmatmul.msk.bf16.gmra.mxu3 %vm405_vm0, %v333_v63 }
  0x68   : > { %1166 = vmatmul.msk.bf16.gmra.mxu0 %vm405_vm0, %v378_v8  ;;  %1174 = vmatmul.msk.bf16.gmra.mxu2 %vm405_vm0, %v386_v9 }
  0x69   : > { %1190 = vmatmul.msk.bf16.gmra.mxu1 %vm405_vm0, %v326_v10 }
  0x6a   : > { %1198 = vmatmul.msk.bf16.gmra.mxu3 %vm405_vm0, %v334_v11 }
  0x78   : > { %1167 = vmatmul.msk.bf16.gmra.mxu0 %vm405_vm0, %v379_v20  ;;  %1175 = vmatmul.msk.bf16.gmra.mxu2 %vm405_vm0, %v387_v21 }
  0x79   : > { %1191 = vmatmul.msk.bf16.gmra.mxu1 %vm405_vm0, %v327_v22 }
  0x7a   : > { %1199 = vmatmul.msk.bf16.gmra.mxu3 %vm405_vm0, %v335_v23 }
  0x88   : > { %1168 = vmatmul.msk.bf16.gmra.mxu0 %vm405_vm0, %v380_v32  ;;  %1176 = vmatmul.msk.bf16.gmra.mxu2 %vm405_vm0, %v388_v33 }
  0x89   : > { %1192 = vmatmul.msk.bf16.gmra.mxu1 %vm405_vm0, %v328_v34 }
  0x8a   : > { %1200 = vmatmul.msk.bf16.gmra.mxu3 %vm405_vm0, %v336_v35 }
  0x95   : > { %v463_v36 = vpop.f32.mrf.mxu0 }
  0x96   : > { %v612_v38 = vpop.f32.mrf.mxu1 }
  0x97   : > { %v613_v39 = vadd.f32 %v612_v38, %v463_v36 }
  0x99   : > { %v696_v40 = vadd.f32 %v1592_v37, %v613_v39 }
  0x9b   : > { %v728_v41 = vmax.f32 %v696_v40, 0.0  ;;  %v503_v42 = vpop.f32.mrf.mxu2 }
  0x9d   : > { %760 = vst [vmem:[%s1595_s29] sm:$0xff] %v728_v41  ;;  %v652_v43 = vpop.f32.mrf.mxu3  ;;  %v465_v44 = vpop.f32.mrf.mxu0 }
  0x9e   : > { %v653_v45 = vadd.f32 %v652_v43, %v503_v42  ;;  %v614_v46 = vpop.f32.mrf.mxu1 }
  0x9f   : > { %v615_v47 = vadd.f32 %v614_v46, %v465_v44 }
  0xa0   : > { %v712_v48 = vadd.f32 %v1592_v37, %v653_v45 }
  0xa1   : > { %v697_v49 = vadd.f32 %v1592_v37, %v615_v47 }
  0xa2   : > { %v744_v50 = vmax.f32 %v712_v48, 0.0 }
  0xa3   : > { %v729_v51 = vmax.f32 %v697_v49, 0.0  ;;  %v505_v52 = vpop.f32.mrf.mxu2 }
  0xa4   : > { %776 = vst [vmem:[%s1595_s29 + $0x80] sm:$0xff] %v744_v50 }
  0xa5   : > { %761 = vst [vmem:[%s1595_s29 + $0x8] sm:$0xff] %v729_v51  ;;  %v654_v53 = vpop.f32.mrf.mxu3  ;;  %v468_v54 = vpop.f32.mrf.mxu0 }
  0xa6   : > { %v655_v55 = vadd.f32 %v654_v53, %v505_v52  ;;  %v617_v56 = vpop.f32.mrf.mxu1 }
  0xa7   : > { %v618_v57 = vadd.f32 %v617_v56, %v468_v54 }
  0xa8   : > { %v713_v58 = vadd.f32 %v1592_v37, %v655_v55 }
  0xa9   : > { %v698_v59 = vadd.f32 %v1592_v37, %v618_v57 }
  0xaa   : > { %v745_v60 = vmax.f32 %v713_v58, 0.0 }
  0xab   : > { %v730_v61 = vmax.f32 %v698_v59, 0.0  ;;  %v508_v62 = vpop.f32.mrf.mxu2 }
  0xac   : > { %777 = vst [vmem:[%s1595_s29 + $0x88] sm:$0xff] %v745_v60 }
  0xad   : > { %762 = vst [vmem:[%s1595_s29 + $0x10] sm:$0xff] %v730_v61  ;;  %v657_v63 = vpop.f32.mrf.mxu3  ;;  %v470_v0 = vpop.f32.mrf.mxu0 }
  0xae   : > { %v658_v1 = vadd.f32 %v657_v63, %v508_v62  ;;  %v619_v2 = vpop.f32.mrf.mxu1 }
  0xaf   : > { %v620_v3 = vadd.f32 %v619_v2, %v470_v0 }
  0xb0   : > { %v714_v4 = vadd.f32 %v1592_v37, %v658_v1 }
  0xb1   : > { %v699_v5 = vadd.f32 %v1592_v37, %v620_v3 }
  0xb2   : > { %v746_v6 = vmax.f32 %v714_v4, 0.0 }
  0xb3   : > { %v731_v7 = vmax.f32 %v699_v5, 0.0  ;;  %v510_v8 = vpop.f32.mrf.mxu2 }
  0xb4   : > { %778 = vst [vmem:[%s1595_s29 + $0x90] sm:$0xff] %v746_v6 }
  0xb5   : > { %763 = vst [vmem:[%s1595_s29 + $0x18] sm:$0xff] %v731_v7  ;;  %v659_v9 = vpop.f32.mrf.mxu3  ;;  %v473_v10 = vpop.f32.mrf.mxu0 }
  0xb6   : > { %v660_v11 = vadd.f32 %v659_v9, %v510_v8  ;;  %v622_v12 = vpop.f32.mrf.mxu1 }
  0xb7   : > { %v623_v13 = vadd.f32 %v622_v12, %v473_v10 }
  0xb8   : > { %v715_v14 = vadd.f32 %v1592_v37, %v660_v11 }
  0xb9   : > { %v700_v15 = vadd.f32 %v1592_v37, %v623_v13 }
  0xba   : > { %v747_v16 = vmax.f32 %v715_v14, 0.0 }
  0xbb   : > { %v732_v17 = vmax.f32 %v700_v15, 0.0  ;;  %v513_v18 = vpop.f32.mrf.mxu2 }
  0xbc   : > { %779 = vst [vmem:[%s1595_s29 + $0x98] sm:$0xff] %v747_v16 }
  0xbd   : > { %764 = vst [vmem:[%s1595_s29 + $0x20] sm:$0xff] %v732_v17  ;;  %v662_v19 = vpop.f32.mrf.mxu3  ;;  %v475_v20 = vpop.f32.mrf.mxu0 }
  0xbe   : > { %v663_v21 = vadd.f32 %v662_v19, %v513_v18  ;;  %v624_v22 = vpop.f32.mrf.mxu1 }
  0xbf   : > { %v625_v23 = vadd.f32 %v624_v22, %v475_v20 }
  0xc0   : > { %v716_v24 = vadd.f32 %v1592_v37, %v663_v21 }
  0xc1   : > { %v701_v25 = vadd.f32 %v1592_v37, %v625_v23 }
  0xc2   : > { %v748_v26 = vmax.f32 %v716_v24, 0.0 }
  0xc3   : > { %v733_v27 = vmax.f32 %v701_v25, 0.0  ;;  %v515_v28 = vpop.f32.mrf.mxu2 }
  0xc4   : > { %780 = vst [vmem:[%s1595_s29 + $0xa0] sm:$0xff] %v748_v26 }
  0xc5   : > { %765 = vst [vmem:[%s1595_s29 + $0x28] sm:$0xff] %v733_v27  ;;  %v664_v29 = vpop.f32.mrf.mxu3  ;;  %v478_v30 = vpop.f32.mrf.mxu0 }
  0xc6   : > { %v665_v31 = vadd.f32 %v664_v29, %v515_v28  ;;  %v627_v32 = vpop.f32.mrf.mxu1 }
  0xc7   : > { %v628_v33 = vadd.f32 %v627_v32, %v478_v30 }
  0xc8   : > { %v717_v34 = vadd.f32 %v1592_v37, %v665_v31 }
  0xc9   : > { %v702_v35 = vadd.f32 %v1592_v37, %v628_v33 }
  0xca   : > { %v749_v36 = vmax.f32 %v717_v34, 0.0 }
  0xcb   : > { %v734_v38 = vmax.f32 %v702_v35, 0.0  ;;  %v518_v39 = vpop.f32.mrf.mxu2 }
  0xcc   : > { %781 = vst [vmem:[%s1595_s29 + $0xa8] sm:$0xff] %v749_v36 }
  0xcd   : > { %766 = vst [vmem:[%s1595_s29 + $0x30] sm:$0xff] %v734_v38  ;;  %v667_v40 = vpop.f32.mrf.mxu3  ;;  %v480_v41 = vpop.f32.mrf.mxu0 }
  0xce   : > { %v668_v42 = vadd.f32 %v667_v40, %v518_v39  ;;  %v629_v43 = vpop.f32.mrf.mxu1 }
  0xcf   : > { %v630_v44 = vadd.f32 %v629_v43, %v480_v41 }
  0xd0   : > { %v718_v45 = vadd.f32 %v1592_v37, %v668_v42 }
  0xd1   : > { %v703_v46 = vadd.f32 %v1592_v37, %v630_v44 }
  0xd2   : > { %v750_v47 = vmax.f32 %v718_v45, 0.0 }
  0xd3   : > { %v735_v48 = vmax.f32 %v703_v46, 0.0  ;;  %v520_v49 = vpop.f32.mrf.mxu2 }
  0xd4   : > { %782 = vst [vmem:[%s1595_s29 + $0xb0] sm:$0xff] %v750_v47 }
  0xd5   : > { %767 = vst [vmem:[%s1595_s29 + $0x38] sm:$0xff] %v735_v48  ;;  %v669_v50 = vpop.f32.mrf.mxu3  ;;  %v483_v51 = vpop.f32.mrf.mxu0 }
  0xd6   : > { %v670_v52 = vadd.f32 %v669_v50, %v520_v49  ;;  %v632_v53 = vpop.f32.mrf.mxu1 }
  0xd7   : > { %v633_v54 = vadd.f32 %v632_v53, %v483_v51 }
  0xd8   : > { %v719_v55 = vadd.f32 %v1592_v37, %v670_v52 }
  0xd9   : > { %v704_v56 = vadd.f32 %v1592_v37, %v633_v54 }
  0xda   : > { %v751_v57 = vmax.f32 %v719_v55, 0.0 }
  0xdb   : > { %v736_v58 = vmax.f32 %v704_v56, 0.0  ;;  %v523_v59 = vpop.f32.mrf.mxu2 }
  0xdc   : > { %783 = vst [vmem:[%s1595_s29 + $0xb8] sm:$0xff] %v751_v57 }
  0xdd   : > { %768 = vst [vmem:[%s1595_s29 + $0x40] sm:$0xff] %v736_v58  ;;  %v672_v60 = vpop.f32.mrf.mxu3  ;;  %v485_v61 = vpop.f32.mrf.mxu0 }
  0xde   : > { %v673_v62 = vadd.f32 %v672_v60, %v523_v59  ;;  %v634_v63 = vpop.f32.mrf.mxu1 }
  0xdf   : > { %v635_v0 = vadd.f32 %v634_v63, %v485_v61 }
  0xe0   : > { %v720_v1 = vadd.f32 %v1592_v37, %v673_v62 }
  0xe1   : > { %v705_v2 = vadd.f32 %v1592_v37, %v635_v0 }
  0xe2   : > { %v752_v3 = vmax.f32 %v720_v1, 0.0 }
  0xe3   : > { %v737_v4 = vmax.f32 %v705_v2, 0.0  ;;  %v525_v5 = vpop.f32.mrf.mxu2 }
  0xe4   : > { %784 = vst [vmem:[%s1595_s29 + $0xc0] sm:$0xff] %v752_v3 }
  0xe5   : > { %769 = vst [vmem:[%s1595_s29 + $0x48] sm:$0xff] %v737_v4  ;;  %v674_v6 = vpop.f32.mrf.mxu3  ;;  %v488_v7 = vpop.f32.mrf.mxu0 }
  0xe6   : > { %v675_v8 = vadd.f32 %v674_v6, %v525_v5  ;;  %v637_v9 = vpop.f32.mrf.mxu1 }
  0xe7   : > { %v638_v10 = vadd.f32 %v637_v9, %v488_v7 }
  0xe8   : > { %v721_v11 = vadd.f32 %v1592_v37, %v675_v8 }
  0xe9   : > { %v706_v12 = vadd.f32 %v1592_v37, %v638_v10 }
  0xea   : > { %v753_v13 = vmax.f32 %v721_v11, 0.0 }
  0xeb   : > { %v738_v14 = vmax.f32 %v706_v12, 0.0  ;;  %v528_v15 = vpop.f32.mrf.mxu2 }
  0xec   : > { %785 = vst [vmem:[%s1595_s29 + $0xc8] sm:$0xff] %v753_v13 }
  0xed   : > { %770 = vst [vmem:[%s1595_s29 + $0x50] sm:$0xff] %v738_v14  ;;  %v677_v16 = vpop.f32.mrf.mxu3  ;;  %v490_v17 = vpop.f32.mrf.mxu0 }
  0xee   : > { %v678_v18 = vadd.f32 %v677_v16, %v528_v15  ;;  %v639_v19 = vpop.f32.mrf.mxu1 }
  0xef   : > { %v640_v20 = vadd.f32 %v639_v19, %v490_v17 }
  0xf0   : > { %v722_v21 = vadd.f32 %v1592_v37, %v678_v18 }
  0xf1   : > { %v707_v22 = vadd.f32 %v1592_v37, %v640_v20 }
  0xf2   : > { %v754_v23 = vmax.f32 %v722_v21, 0.0 }
  0xf3   : > { %v739_v24 = vmax.f32 %v707_v22, 0.0  ;;  %v530_v25 = vpop.f32.mrf.mxu2 }
  0xf4   : > { %786 = vst [vmem:[%s1595_s29 + $0xd0] sm:$0xff] %v754_v23 }
  0xf5   : > { %771 = vst [vmem:[%s1595_s29 + $0x58] sm:$0xff] %v739_v24  ;;  %v679_v26 = vpop.f32.mrf.mxu3  ;;  %v493_v27 = vpop.f32.mrf.mxu0 }
  0xf6   : > { %v680_v28 = vadd.f32 %v679_v26, %v530_v25  ;;  %v642_v29 = vpop.f32.mrf.mxu1 }
  0xf7   : > { %v643_v30 = vadd.f32 %v642_v29, %v493_v27 }
  0xf8   : > { %v723_v31 = vadd.f32 %v1592_v37, %v680_v28 }
  0xf9   : > { %v708_v32 = vadd.f32 %v1592_v37, %v643_v30 }
  0xfa   : > { %v755_v33 = vmax.f32 %v723_v31, 0.0 }
  0xfb   : > { %v740_v34 = vmax.f32 %v708_v32, 0.0  ;;  %v533_v35 = vpop.f32.mrf.mxu2 }
  0xfc   : > { %787 = vst [vmem:[%s1595_s29 + $0xd8] sm:$0xff] %v755_v33 }
  0xfd   : > { %772 = vst [vmem:[%s1595_s29 + $0x60] sm:$0xff] %v740_v34  ;;  %v682_v36 = vpop.f32.mrf.mxu3  ;;  %v495_v38 = vpop.f32.mrf.mxu0 }
  0xfe   : > { %v683_v39 = vadd.f32 %v682_v36, %v533_v35  ;;  %v644_v40 = vpop.f32.mrf.mxu1 }
  0xff   : > { %v645_v41 = vadd.f32 %v644_v40, %v495_v38 }
 0x100   : > { %v724_v42 = vadd.f32 %v1592_v37, %v683_v39 }
 0x101   : > { %v709_v43 = vadd.f32 %v1592_v37, %v645_v41 }
 0x102   : > { %v756_v44 = vmax.f32 %v724_v42, 0.0 }
 0x103   : > { %v741_v45 = vmax.f32 %v709_v43, 0.0  ;;  %v535_v46 = vpop.f32.mrf.mxu2 }
 0x104   : > { %788 = vst [vmem:[%s1595_s29 + $0xe0] sm:$0xff] %v756_v44 }
 0x105   : > { %773 = vst [vmem:[%s1595_s29 + $0x68] sm:$0xff] %v741_v45  ;;  %v684_v47 = vpop.f32.mrf.mxu3  ;;  %v498_v48 = vpop.f32.mrf.mxu0 }
 0x106   : > { %v685_v49 = vadd.f32 %v684_v47, %v535_v46  ;;  %v647_v50 = vpop.f32.mrf.mxu1 }
 0x107   : > { %v648_v51 = vadd.f32 %v647_v50, %v498_v48 }
 0x108   : > { %v725_v52 = vadd.f32 %v1592_v37, %v685_v49 }
 0x109   : > { %v710_v53 = vadd.f32 %v1592_v37, %v648_v51 }
 0x10a   : > { %v757_v54 = vmax.f32 %v725_v52, 0.0 }
 0x10b   : > { %v742_v55 = vmax.f32 %v710_v53, 0.0  ;;  %v538_v56 = vpop.f32.mrf.mxu2 }
 0x10c   : > { %789 = vst [vmem:[%s1595_s29 + $0xe8] sm:$0xff] %v757_v54 }
 0x10d   : > { %774 = vst [vmem:[%s1595_s29 + $0x70] sm:$0xff] %v742_v55  ;;  %v687_v57 = vpop.f32.mrf.mxu3  ;;  %v500_v58 = vpop.f32.mrf.mxu0 }
 0x10e   : > { %v688_v59 = vadd.f32 %v687_v57, %v538_v56  ;;  %v649_v60 = vpop.f32.mrf.mxu1 }
 0x10f   : > { %v650_v61 = vadd.f32 %v649_v60, %v500_v58 }
 0x110   : > { %v726_v62 = vadd.f32 %v1592_v37, %v688_v59 }
 0x111   : > { %v711_v63 = vadd.f32 %v1592_v37, %v650_v61 }
 0x112   : > { %v758_v0 = vmax.f32 %v726_v62, 0.0 }
 0x113   : > { %v743_v1 = vmax.f32 %v711_v63, 0.0  ;;  %v540_v2 = vpop.f32.mrf.mxu2 }
 0x114   : > { %790 = vst [vmem:[%s1595_s29 + $0xf0] sm:$0xff] %v758_v0 }
 0x115   : > { %775 = vst [vmem:[%s1595_s29 + $0x78] sm:$0xff] %v743_v1  ;;  %v689_v3 = vpop.f32.mrf.mxu3 }
 0x116   : > { %v690_v4 = vadd.f32 %v689_v3, %v540_v2 }
 0x118   : > { %v727_v5 = vadd.f32 %v1592_v37, %v690_v4  ;;  %798 = sbr.rel (!%p1461_p4) target bundleno = 349 (0x15d), region = 44 }
 0x11a   : > { %v759_v6 = vmax.f32 %v727_v5, 0.0 }
 0x11c   : > { %791 = vst [vmem:[%s1595_s29 + $0xf8] sm:$0xff] %v759_v6 }
 0x11d   : > { %s1818_s18 = smov (!%p801_p8, %s800_s18), 32 }
 0x11e   : > { %s1203_s10 = sshll.u32 %s1818_s18, 3 }
 0x11f   : > { %p1206_p9 = scmp.eq.s32.totalorder %s1203_s10, 0 }
 0x120   : > { %s1673_s11 = sshrl.u32 (!%p1206_p9), %s1818_s18, 5 }
 0x121   : > { %809 = sbr.rel (%p1206_p9) target bundleno = 349 (0x15d), region = 48  ;;  %p1207_p10 = scmp.le.s32.totalorder (!%p1206_p9), %s1673_s11, 0 }
 0x126   : > { %1094 = sbr.rel (%p1207_p10) target bundleno = 332 (0x14c), region = 127  ;;  %s1809_s21 = smov (!%p1207_p10), %s1667_s9 }
 0x127   : > { %s1810_s26 = smov (!%p1207_p10), %s1595_s29  ;;  %s1682_s6 = smov (!%p1207_p10), 0  }
 0x128   : > { %s1684_s12 = smov (!%p1207_p10), 0  }
 0x12b LB: >> { %v934_v37 = vld [vmem:[%s1380_s26] sm:$0xff]  ;;  %v936_v7 = vld [vmem:[%s1380_s26 + $0x8] sm:$0xff]  ;;  %v938_v8 = vld [vmem:[%s1380_s26 + $0x10] sm:$0xff]  ;;  %s998_s13 = sadd.s32 1, %s1384_s6  ;;  %s928_s12 = sadd.s32 1, %s1388_s12   ;;  %s1388_s12 = sphi %s1684_s12, %s928_s12   ;;  %s1384_s6 = sphi %s1682_s6, %s1813_s6   ;;  %s1380_s26 = sphi %s1810_s26, %s1812_s26   ;;  %s1376_s21 = sphi %s1809_s21, %s1811_s21  }
 0x12c   : >> { %935 = vst [vmem:[%s1376_s21] sm:$0xff] %v934_v37  ;;  %v940_v9 = vld [vmem:[%s1380_s26 + $0x18] sm:$0xff]  ;;  %p999_p11 = scmp.ge.s32.totalorder %s998_s13, %s1673_s11  ;;  %v942_v10 = vld [vmem:[%s1380_s26 + $0x20] sm:$0xff]  ;;  %v944_v11 = vld [vmem:[%s1380_s26 + $0x28] sm:$0xff]  ;;  %p927_p12 = scmp.ge.s32.totalorder %s928_s12, %s1673_s11 }
 0x12d   : >> { %937 = vst [vmem:[%s1376_s21 + $0x8] sm:$0xff] %v936_v7  ;;  %v946_v12 = vld [vmem:[%s1380_s26 + $0x30] sm:$0xff]  ;;  %v948_v13 = vld [vmem:[%s1380_s26 + $0x38] sm:$0xff]  ;;  %v950_v14 = vld [vmem:[%s1380_s26 + $0x40] sm:$0xff] }
 0x12e   : >> { %939 = vst [vmem:[%s1376_s21 + $0x10] sm:$0xff] %v938_v8  ;;  %s1820_s13 = smov (%p999_p11, %s998_s13), 0  ;;  %v952_v15 = vld [vmem:[%s1380_s26 + $0x48] sm:$0xff]  ;;  %v954_v16 = vld [vmem:[%s1380_s26 + $0x50] sm:$0xff]  ;;  %v956_v17 = vld [vmem:[%s1380_s26 + $0x58] sm:$0xff] }
 0x12f   : >> { %941 = vst [vmem:[%s1376_s21 + $0x18] sm:$0xff] %v940_v9  ;;  %s1208_s14 = sshll.u32 %s1820_s13, 8  ;;  %v958_v18 = vld [vmem:[%s1380_s26 + $0x60] sm:$0xff]  ;;  %v960_v19 = vld [vmem:[%s1380_s26 + $0x68] sm:$0xff]  ;;  %v962_v20 = vld [vmem:[%s1380_s26 + $0x70] sm:$0xff]  ;;  %s1813_s6 = smov %s1820_s13 }
 0x130   : >> { %943 = vst [vmem:[%s1376_s21 + $0x20] sm:$0xff] %v942_v10  ;;  %s1716_s15 = scalar_lea.vmem %s1595_s29, %s1208_s14 [#allocation2]   ;;  %s1719_s16 = scalar_lea.vmem %s1667_s9, %s1208_s14   ;;  %v964_v21 = vld [vmem:[%s1380_s26 + $0x78] sm:$0xff]  ;;  %v966_v22 = vld [vmem:[%s1380_s26 + $0x80] sm:$0xff]  ;;  %v968_v23 = vld [vmem:[%s1380_s26 + $0x88] sm:$0xff] }
 0x131   : >> { %945 = vst [vmem:[%s1376_s21 + $0x28] sm:$0xff] %v944_v11  ;;  %v970_v24 = vld [vmem:[%s1380_s26 + $0x90] sm:$0xff]  ;;  %v972_v25 = vld [vmem:[%s1380_s26 + $0x98] sm:$0xff]  ;;  %v974_v26 = vld [vmem:[%s1380_s26 + $0xa0] sm:$0xff] }
 0x132   : >> { %947 = vst [vmem:[%s1376_s21 + $0x30] sm:$0xff] %v946_v12  ;;  %v976_v27 = vld [vmem:[%s1380_s26 + $0xa8] sm:$0xff]  ;;  %v978_v28 = vld [vmem:[%s1380_s26 + $0xb0] sm:$0xff]  ;;  %v980_v29 = vld [vmem:[%s1380_s26 + $0xb8] sm:$0xff] }
 0x133   : >> { %949 = vst [vmem:[%s1376_s21 + $0x38] sm:$0xff] %v948_v13  ;;  %v982_v30 = vld [vmem:[%s1380_s26 + $0xc0] sm:$0xff]  ;;  %v984_v31 = vld [vmem:[%s1380_s26 + $0xc8] sm:$0xff]  ;;  %v986_v32 = vld [vmem:[%s1380_s26 + $0xd0] sm:$0xff] }
 0x134   : >> { %951 = vst [vmem:[%s1376_s21 + $0x40] sm:$0xff] %v950_v14  ;;  %v988_v33 = vld [vmem:[%s1380_s26 + $0xd8] sm:$0xff]  ;;  %v990_v34 = vld [vmem:[%s1380_s26 + $0xe0] sm:$0xff]  ;;  %v992_v35 = vld [vmem:[%s1380_s26 + $0xe8] sm:$0xff] }
 0x135   : >> { %953 = vst [vmem:[%s1376_s21 + $0x48] sm:$0xff] %v952_v15  ;;  %v994_v36 = vld [vmem:[%s1380_s26 + $0xf0] sm:$0xff]  ;;  %v996_v38 = vld [vmem:[%s1380_s26 + $0xf8] sm:$0xff]  ;;  %s1812_s26 = smov %s1716_s15 }
 0x136   : >> { %955 = vst [vmem:[%s1376_s21 + $0x50] sm:$0xff] %v954_v16 }
 0x137   : >> { %957 = vst [vmem:[%s1376_s21 + $0x58] sm:$0xff] %v956_v17 }
 0x138   : >> { %959 = vst [vmem:[%s1376_s21 + $0x60] sm:$0xff] %v958_v18 }
 0x139   : >> { %961 = vst [vmem:[%s1376_s21 + $0x68] sm:$0xff] %v960_v19 }
 0x13a   : >> { %963 = vst [vmem:[%s1376_s21 + $0x70] sm:$0xff] %v962_v20 }
 0x13b   : >> { %965 = vst [vmem:[%s1376_s21 + $0x78] sm:$0xff] %v964_v21 }
 0x13c   : >> { %967 = vst [vmem:[%s1376_s21 + $0x80] sm:$0xff] %v966_v22 }
 0x13d   : >> { %969 = vst [vmem:[%s1376_s21 + $0x88] sm:$0xff] %v968_v23 }
 0x13e   : >> { %971 = vst [vmem:[%s1376_s21 + $0x90] sm:$0xff] %v970_v24 }
 0x13f   : >> { %973 = vst [vmem:[%s1376_s21 + $0x98] sm:$0xff] %v972_v25 }
 0x140   : >> { %975 = vst [vmem:[%s1376_s21 + $0xa0] sm:$0xff] %v974_v26 }
 0x141   : >> { %977 = vst [vmem:[%s1376_s21 + $0xa8] sm:$0xff] %v976_v27 }
 0x142   : >> { %979 = vst [vmem:[%s1376_s21 + $0xb0] sm:$0xff] %v978_v28 }
 0x143   : >> { %981 = vst [vmem:[%s1376_s21 + $0xb8] sm:$0xff] %v980_v29 }
 0x144   : >> { %983 = vst [vmem:[%s1376_s21 + $0xc0] sm:$0xff] %v982_v30 }
 0x145   : >> { %985 = vst [vmem:[%s1376_s21 + $0xc8] sm:$0xff] %v984_v31 }
 0x146   : >> { %987 = vst [vmem:[%s1376_s21 + $0xd0] sm:$0xff] %v986_v32 }
 0x147   : >> { %989 = vst [vmem:[%s1376_s21 + $0xd8] sm:$0xff] %v988_v33  ;;  %930 = sbr.rel (!%p927_p12) target bundleno = 299 (0x12b), region = 133 }
 0x148   : >> { %991 = vst [vmem:[%s1376_s21 + $0xe0] sm:$0xff] %v990_v34 }
 0x149   : >> { %993 = vst [vmem:[%s1376_s21 + $0xe8] sm:$0xff] %v992_v35 }
 0x14a   : >> { %995 = vst [vmem:[%s1376_s21 + $0xf0] sm:$0xff] %v994_v36 }
 0x14b   : >> { %997 = vst [vmem:[%s1376_s21 + $0xf8] sm:$0xff] %v996_v38  ;;  %s1811_s21 = smov %s1719_s16 }
 0x14c PF: > { %s1784_s17 = sand.u32 31, %s1818_s18   ;;  %s1223_s20 = sshll.u32 %s1673_s11, 8 }
 0x14d   : > { %s1009_s23 = scalar_lea.vmem %s1595_s29, %s1223_s20 [#allocation2]   ;;  %s1011_s24 = scalar_lea.vmem %s1667_s9, %s1223_s20  }
 0x14e   : > { %p1213_p13 = scmp.le.s32.totalorder %s1784_s17, 0 }
 0x14f   : > { %s1390_s27 = smov (!%p1213_p13), %s1011_s24   ;;  %s1394_s28 = smov (!%p1213_p13), %s1009_s23  }
 0x150   : > { %1108 = sbr.rel (%p1213_p13) target bundleno = 349 (0x15d), region = 138  ;;  %s1398_s30 = smov (!%p1213_p13), 0  }
 0x151   : > { %s1402_s7 = smov (!%p1213_p13), 0  }
 0x155 LB: >> { %v1021_v39 = vld [vmem:[%s1396_s28] sm:$0xff]  ;;  %s1023_s18 = sadd.s32 1, %s1400_s30  ;;  %s1015_s7 = sadd.s32 1, %s1404_s7   ;;  %s1404_s7 = sphi %s1402_s7, %s1015_s7   ;;  %s1400_s30 = sphi %s1398_s30, %s1399_s30   ;;  %s1396_s28 = sphi %s1394_s28, %s1028_s28   ;;  %s1392_s27 = sphi %s1390_s27, %s1029_s27  }
 0x156   : >> { %1022 = vst [vmem:[%s1392_s27] sm:$0xff] %v1021_v39  ;;  %p1024_p0 = scmp.ge.s32.totalorder %s1023_s18, %s1784_s17  ;;  %p1014_p1 = scmp.ge.s32.totalorder %s1015_s7, %s1784_s17 }
 0x158   : >> { %s1822_s18 = smov (%p1024_p0, %s1023_s18), 0  ;;  %1017 = sbr.rel (!%p1014_p1) target bundleno = 341 (0x155), region = 144 }
 0x159   : >> { %s1214_s29 = sshll.u32 %s1822_s18, 3  ;;  %s1399_s30 = smov %s1822_s18  }
 0x15a   : >> { %s1028_s28 = scalar_lea.vmem %s1009_s23, %s1214_s29 [#allocation2]   ;;  %s1029_s27 = scalar_lea.vmem %s1011_s24, %s1214_s29  }
 0x15d PF: > { %p12_p2 = scmp.ge.s32.totalorder %s1451_s22, 4   ;;  %s1814_s18 = smov %s1368_s19 }
 0x15e   : > { %s1815_s19 = smov %s1459_s25  ;;  %s1816_s20 = smov %s1451_s22 }
 0x15f   :  { %14 = sbr.rel (!%p12_p2) target bundleno = 2 (0x2), region = 155 }

</bundles_post_ra>
